<compile_context>
chip_gen: v6e
topology: v6e:2x2x1
jax: 0.10.0
libtpu: 0.0.40
codegen_flags: <defaults>
</compile_context>

<pallas_src>
import math

import jax
import jax.numpy as jnp
from jax.experimental import pallas as pl
from jax.experimental.pallas import tpu as pltpu

LN_EPS = 1e-5
F32 = jnp.float32
BF16 = jnp.bfloat16


# ----------------------------------------------------------------------------- helpers
def _layer_norm(x, gamma, beta):
    mu = jnp.mean(x, axis=-1, keepdims=True)
    var = jnp.mean(jnp.square(x - mu), axis=-1, keepdims=True)
    return (x - mu) * jax.lax.rsqrt(var + LN_EPS) * gamma + beta


def _mm(a, b_bf16):
    """bf16 MXU matmul with f32 accumulation (weights already bf16)."""
    return jnp.dot(a.astype(BF16), b_bf16, preferred_element_type=F32)


# ----------------------------------------------------------------------------- Net MLP kernel
def _mlp_kernel(x_ref, w1_ref, b1_ref, w2_ref, b2_ref, w3_ref, b3_ref, o_ref):
    x = x_ref[...].astype(F32)
    h = jnp.maximum(_mm(x, w1_ref[...]) + b1_ref[...], 0.0)
    h = jnp.maximum(_mm(h, w2_ref[...]) + b2_ref[...], 0.0)
    o_ref[...] = (_mm(h, w3_ref[...]) + b3_ref[...]).astype(o_ref.dtype)


def mlp_apply(x3d, p):
    """Net MLP over tokens: fold (B, S) into rows, tile rows across the grid."""
    B, S, Din = x3d.shape
    N = B * S
    D1, D2, D3 = p["w1t"].shape[1], p["w2t"].shape[1], p["w3t"].shape[1]
    x2 = x3d.reshape(N, Din)

    tn = N if N <= 512 else 512
    Np = pl.cdiv(N, tn) * tn
    if Np != N:
        x2 = jnp.pad(x2, ((0, Np - N), (0, 0)))

    full = lambda shape: pl.BlockSpec(shape, lambda i: (0, 0))
    out = pl.pallas_call(
        _mlp_kernel,
        out_shape=jax.ShapeDtypeStruct((Np, D3), F32),
        grid_spec=pltpu.PrefetchScalarGridSpec(
            num_scalar_prefetch=0,
            grid=(Np // tn,),
            in_specs=[
                pl.BlockSpec((tn, Din), lambda i: (i, 0)),
                full((Din, D1)), full((1, D1)),
                full((D1, D2)), full((1, D2)),
                full((D2, D3)), full((1, D3)),
            ],
            out_specs=pl.BlockSpec((tn, D3), lambda i: (i, 0)),
        ),
        compiler_params=pltpu.CompilerParams(dimension_semantics=("parallel",)),
    )(x2, p["w1t"], p["b1"], p["w2t"], p["b2"], p["w3t"], p["b3"])
    return out[:N].reshape(B, S, D3)


# --------------------------------------------------------------- pre-norm transformer layer kernel
def make_prenorm_layer_kernel(nhead, bt, S, E):
    hd = E // nhead
    N = bt * S

    def kernel(x_ref, wqkv_ref, bqkv_ref, wo_ref, bo_ref,
               w1_ref, b1_ref, w2_ref, b2_ref,
               ln1w_ref, ln1b_ref, ln2w_ref, ln2b_ref, o_ref):
        x = x_ref[...].astype(F32).reshape(N, E)              # residual stream (f32)

        # ---- self-attention block: x = x + MHA(LN1(x)) ----
        h = _layer_norm(x, ln1w_ref[...], ln1b_ref[...])
        qkv = _mm(h, wqkv_ref[...]) + bqkv_ref[...]           # fused (N, 3E); Q pre-scaled on host
        wo = wo_ref[...]                                      # (E, E) = Wo^T, bf16

        attn = jnp.zeros((N, E), F32)
        for hh in range(nhead):                               # static unroll over heads
            q_h = qkv[:, hh * hd:(hh + 1) * hd].reshape(bt, S, hd)
            k_h = qkv[:, E + hh * hd: E + (hh + 1) * hd].reshape(bt, S, hd)
            v_h = qkv[:, 2 * E + hh * hd: 2 * E + (hh + 1) * hd].reshape(bt, S, hd)
            s = jnp.einsum("bqd,bkd->bqk", q_h.astype(BF16), k_h.astype(BF16),
                           preferred_element_type=F32)        # (bt, S, S)
            s = s - jnp.max(s, axis=-1, keepdims=True)
            p = jnp.exp(s)
            p = p * pl.reciprocal(jnp.sum(p, axis=-1, keepdims=True), approx=True)
            o_h = jnp.einsum("bqk,bkd->bqd", p.astype(BF16), v_h.astype(BF16),
                             preferred_element_type=F32)      # (bt, S, hd)
            # accumulate head output through its (hd, E) row-block of Wo^T (no concat)
            attn = attn + _mm(o_h.reshape(N, hd), wo[hh * hd:(hh + 1) * hd, :])
        x = x + attn + bo_ref[...]

        # ---- feed-forward block: x = x + Linear2(ReLU(Linear1(LN2(x)))) ----
        h2 = _layer_norm(x, ln2w_ref[...], ln2b_ref[...])
        ff = jnp.maximum(_mm(h2, w1_ref[...]) + b1_ref[...], 0.0)
        x = x + _mm(ff, w2_ref[...]) + b2_ref[...]

        o_ref[...] = x.reshape(bt, S, E).astype(o_ref.dtype)

    return kernel


def prenorm_layer_apply(x, p, nhead):
    B, S, E = x.shape
    H = p["w1t"].shape[1]                                     # 2*E
    bt = B if B * S <= 2048 else 1                            # amortize per-grid-step overhead
    full2 = lambda shape: pl.BlockSpec(shape, lambda b: (0, 0))

    cost = pl.CostEstimate(
        flops=int(B * S * E * (16 * E + 4 * S)),
        transcendentals=int(B * nhead * S * S),
        bytes_accessed=int(2 * B * S * E * 4 + 8 * E * E * 2),
    )
    return pl.pallas_call(
        make_prenorm_layer_kernel(nhead, bt, S, E),
        out_shape=jax.ShapeDtypeStruct((B, S, E), x.dtype),
        grid_spec=pltpu.PrefetchScalarGridSpec(
            num_scalar_prefetch=0,
            grid=(B // bt,),
            in_specs=[
                pl.BlockSpec((bt, S, E), lambda b: (b, 0, 0)),
                full2((E, 3 * E)), full2((1, 3 * E)),
                full2((E, E)), full2((1, E)),
                full2((E, H)), full2((1, H)),
                full2((H, E)), full2((1, E)),
                full2((1, E)), full2((1, E)),
                full2((1, E)), full2((1, E)),
            ],
            out_specs=pl.BlockSpec((bt, S, E), lambda b: (b, 0, 0)),
        ),
        compiler_params=pltpu.CompilerParams(dimension_semantics=("parallel",)),
        cost_estimate=cost,
    )(x, p["wqkv_t"], p["bqkv"], p["wo_t"], p["bo"],
      p["w1t"], p["b1"], p["w2t"], p["b2"],
      p["ln1w"], p["ln1b"], p["ln2w"], p["ln2b"])


# ----------------------------------------------------------------------- cross-attention kernel
def make_cross_attn_kernel(nhead, bt, Sq, Sk, E):
    hd = E // nhead
    Nq, Nk = bt * Sq, bt * Sk

    def kernel(q_ref, kv_ref, wq_ref, bq_ref, wkv_ref, bkv_ref, wo_ref, bo_ref, o_ref):
        q_in = q_ref[...].astype(F32).reshape(Nq, E)
        kv_in = kv_ref[...].astype(F32).reshape(Nk, E)

        qp = _mm(q_in, wq_ref[...]) + bq_ref[...]             # (Nq, E); pre-scaled
        kvp = _mm(kv_in, wkv_ref[...]) + bkv_ref[...]         # (Nk, 2E) fused K/V
        wo = wo_ref[...]

        attn = jnp.zeros((Nq, E), F32)
        for hh in range(nhead):
            q_h = qp[:, hh * hd:(hh + 1) * hd].reshape(bt, Sq, hd)
            k_h = kvp[:, hh * hd:(hh + 1) * hd].reshape(bt, Sk, hd)
            v_h = kvp[:, E + hh * hd: E + (hh + 1) * hd].reshape(bt, Sk, hd)
            s = jnp.einsum("bqd,bkd->bqk", q_h.astype(BF16), k_h.astype(BF16),
                           preferred_element_type=F32)
            s = s - jnp.max(s, axis=-1, keepdims=True)
            p = jnp.exp(s)
            p = p * pl.reciprocal(jnp.sum(p, axis=-1, keepdims=True), approx=True)
            o_h = jnp.einsum("bqk,bkd->bqd", p.astype(BF16), v_h.astype(BF16),
                             preferred_element_type=F32)
            attn = attn + _mm(o_h.reshape(Nq, hd), wo[hh * hd:(hh + 1) * hd, :])

        z = q_in + attn + bo_ref[...]                         # z = q + cross(q, latents, latents)
        o_ref[...] = z.reshape(bt, Sq, E).astype(o_ref.dtype)

    return kernel


def cross_attn_apply(q, latents, p, nhead):
    B, Sq, E = q.shape
    Sk = latents.shape[1]
    bt = B if B * max(Sq, Sk) <= 2048 else 1
    full2 = lambda shape: pl.BlockSpec(shape, lambda b: (0, 0))
    return pl.pallas_call(
        make_cross_attn_kernel(nhead, bt, Sq, Sk, E),
        out_shape=jax.ShapeDtypeStruct((B, Sq, E), q.dtype),
        grid_spec=pltpu.PrefetchScalarGridSpec(
            num_scalar_prefetch=0,
            grid=(B // bt,),
            in_specs=[
                pl.BlockSpec((bt, Sq, E), lambda b: (b, 0, 0)),
                pl.BlockSpec((bt, Sk, E), lambda b: (b, 0, 0)),
                full2((E, E)), full2((1, E)),
                full2((E, 2 * E)), full2((1, 2 * E)),
                full2((E, E)), full2((1, E)),
            ],
            out_specs=pl.BlockSpec((bt, Sq, E), lambda b: (b, 0, 0)),
        ),
        compiler_params=pltpu.CompilerParams(dimension_semantics=("parallel",)),
    )(q, latents, p["wq_t"], p["bq"], p["wkv_t"], p["bkv"], p["wo_t"], p["bo"])


# ---------------------------------------------------------------------------- full forward
def tfsfullpn_forward(xc, yc, xt, kparams, nhead, nlayers, share_blocks=True):
    latents = mlp_apply(jnp.concatenate([xc, yc], axis=-1), kparams["encoder"])
    for i in range(nlayers):
        blk = kparams["blocks"][0 if share_blocks else i]
        latents = prenorm_layer_apply(latents, blk, nhead)
    q = mlp_apply(xt, kparams["q_encoder"])
    z = cross_attn_apply(q, latents, kparams["cross"], nhead)
    return mlp_apply(z, kparams["decoder"])


# ------------------------------------------------------------- parameter init (PyTorch layout)
def _linear_init(key, out_dim, in_dim):
    kw, kb = jax.random.split(key)
    lim = 1.0 / math.sqrt(in_dim)
    return (jax.random.uniform(kw, (out_dim, in_dim), F32, -lim, lim),
            jax.random.uniform(kb, (out_dim,), F32, -lim, lim))


def init_torch_params(key, dim_x, dim_yc, dim_yt, dim_h, nhead, nlayers, share_blocks=True):
    keys = iter(jax.random.split(key, 16))

    def net_params(k, dims):
        ks = jax.random.split(k, len(dims) - 1)
        return [_linear_init(ks[i], dims[i + 1], dims[i]) for i in range(len(dims) - 1)]

    def mha_params(k, E):
        k1, k2, k3 = jax.random.split(k, 3)
        lim = 1.0 / math.sqrt(E)
        return {
            "in_proj_w": jax.random.uniform(k1, (3 * E, E), F32, -lim, lim),
            "in_proj_b": jax.random.uniform(k2, (3 * E,), F32, -lim, lim),
            "out_proj_w": jax.random.uniform(k3, (E, E), F32, -lim, lim),
            "out_proj_b": jnp.zeros((E,), F32),
        }

    def block_params(k, E):
        k1, k2, k3, k4, k5 = jax.random.split(k, 5)
        mha = mha_params(k1, E)
        lin1_w, lin1_b = _linear_init(k2, 2 * E, E)
        lin2_w, lin2_b = _linear_init(k3, E, 2 * E)
        return dict(
            mha, lin1_w=lin1_w, lin1_b=lin1_b, lin2_w=lin2_w, lin2_b=lin2_b,
            norm1_w=1.0 + 0.05 * jax.random.normal(k4, (E,), F32),
            norm1_b=0.02 * jax.random.normal(k5, (E,), F32),
            norm2_w=jnp.ones((E,), F32),
            norm2_b=jnp.zeros((E,), F32),
        )

    if share_blocks:
        blocks = [block_params(next(keys), dim_h)] * nlayers       # shared module, like [layer]*n
    else:
        blocks = [block_params(next(keys), dim_h) for _ in range(nlayers)]

    return {
        "encoder": net_params(next(keys), [dim_x + dim_yc, dim_h, dim_h, dim_h]),
        "q_encoder": net_params(next(keys), [dim_x, dim_h, dim_h, dim_h]),
        "decoder": net_params(next(keys), [dim_h, dim_h, dim_h, dim_yt]),
        "blocks": blocks,
        "cross": mha_params(next(keys), dim_h),
    }


# ------------------------------------------ host-side prep: transpose, fold scale, cast to bf16
def prepare_mlp(tp):
    (w1, b1), (w2, b2), (w3, b3) = tp
    return {"w1t": w1.T.astype(BF16), "b1": b1[None, :],
            "w2t": w2.T.astype(BF16), "b2": b2[None, :],
            "w3t": w3.T.astype(BF16), "b3": b3[None, :]}


def prepare_block(tp, nhead):
    E = tp["norm1_w"].shape[0]
    scale = 1.0 / math.sqrt(E // nhead)
    sv = jnp.concatenate([jnp.full((E,), scale, F32), jnp.ones((2 * E,), F32)])
    return {
        "wqkv_t": (tp["in_proj_w"].T * sv[None, :]).astype(BF16),   # (E, 3E), Q columns pre-scaled
        "bqkv": (tp["in_proj_b"] * sv)[None, :],
        "wo_t": tp["out_proj_w"].T.astype(BF16), "bo": tp["out_proj_b"][None, :],
        "w1t": tp["lin1_w"].T.astype(BF16), "b1": tp["lin1_b"][None, :],
        "w2t": tp["lin2_w"].T.astype(BF16), "b2": tp["lin2_b"][None, :],
        "ln1w": tp["norm1_w"][None, :], "ln1b": tp["norm1_b"][None, :],
        "ln2w": tp["norm2_w"][None, :], "ln2b": tp["norm2_b"][None, :],
    }


def prepare_cross(tp, nhead):
    E = tp["out_proj_b"].shape[0]
    scale = 1.0 / math.sqrt(E // nhead)
    return {
        "wq_t": (tp["in_proj_w"][:E] * scale).T.astype(BF16), "bq": (tp["in_proj_b"][:E] * scale)[None, :],
        "wkv_t": tp["in_proj_w"][E:].T.astype(BF16), "bkv": tp["in_proj_b"][E:][None, :],
        "wo_t": tp["out_proj_w"].T.astype(BF16), "bo": tp["out_proj_b"][None, :],
    }


def prepare_params(tparams, nhead):
    seen = {}
    blocks = []
    for b in tparams["blocks"]:
        if id(b) not in seen:
            seen[id(b)] = prepare_block(b, nhead)
        blocks.append(seen[id(b)])
    return {"encoder": prepare_mlp(tparams["encoder"]),
            "q_encoder": prepare_mlp(tparams["q_encoder"]),
            "decoder": prepare_mlp(tparams["decoder"]),
            "blocks": blocks,
            "cross": prepare_cross(tparams["cross"], nhead)}


# -------------------------------------------------------- pure-JAX reference (mirrors bf16 rounding)
def _ref_mm(a, b):
    return jnp.dot(a.astype(BF16), b.astype(BF16), preferred_element_type=F32)


def ref_mlp(x, tp):
    h = x
    for i, (w, b) in enumerate(tp):
        h = _ref_mm(h, w.T) + b
        if i < len(tp) - 1:
            h = jnp.maximum(h, 0.0)
    return h


def ref_mha(q_in, kv_in, W_in, b_in, Wo, bo, nhead):
    E = q_in.shape[-1]
    hd = E // nhead
    scale = 1.0 / math.sqrt(hd)
    q = _ref_mm(q_in, (W_in[:E] * scale).T) + b_in[:E] * scale
    k = _ref_mm(kv_in, W_in[E:2 * E].T) + b_in[E:2 * E]
    v = _ref_mm(kv_in, W_in[2 * E:].T) + b_in[2 * E:]
    B, Sq, _ = q.shape
    Sk = k.shape[1]
    qh = q.reshape(B, Sq, nhead, hd).transpose(0, 2, 1, 3)
    kh = k.reshape(B, Sk, nhead, hd).transpose(0, 2, 1, 3)
    vh = v.reshape(B, Sk, nhead, hd).transpose(0, 2, 1, 3)
    s = jnp.einsum("bhqd,bhkd->bhqk", qh.astype(BF16), kh.astype(BF16), preferred_element_type=F32)
    p = jax.nn.softmax(s, axis=-1)
    o = jnp.einsum("bhqk,bhkd->bhqd", p.astype(BF16), vh.astype(BF16), preferred_element_type=F32)
    o = o.transpose(0, 2, 1, 3).reshape(B, Sq, E)
    return _ref_mm(o, Wo.T) + bo


def ref_prenorm_block(x, tp, nhead):
    h = _layer_norm(x, tp["norm1_w"], tp["norm1_b"])
    x = x + ref_mha(h, h, tp["in_proj_w"], tp["in_proj_b"], tp["out_proj_w"], tp["out_proj_b"], nhead)
    h = _layer_norm(x, tp["norm2_w"], tp["norm2_b"])
    ff = jnp.maximum(_ref_mm(h, tp["lin1_w"].T) + tp["lin1_b"], 0.0)
    return x + _ref_mm(ff, tp["lin2_w"].T) + tp["lin2_b"]


def ref_forward(xc, yc, xt, tp, nhead, nlayers, share_blocks=True):
    latents = ref_mlp(jnp.concatenate([xc, yc], axis=-1), tp["encoder"])
    for i in range(nlayers):
        blk = tp["blocks"][0 if share_blocks else i]
        latents = ref_prenorm_block(latents, blk, nhead)
    q = ref_mlp(xt, tp["q_encoder"])
    c = tp["cross"]
    z = q + ref_mha(q, latents, c["in_proj_w"], c["in_proj_b"], c["out_proj_w"], c["out_proj_b"], nhead)
    return ref_mlp(z, tp["decoder"])


# ---------------------------------------------------------------------------------------- main
if __name__ == "__main__":
    dim_x, dim_yc, dim_yt = 2, 1, 1
    dim_h, nhead, nlayers = 128, 4, 2
    B, num_ctx, num_tgt = 2, 16, 8
    share_blocks = True

    key = jax.random.PRNGKey(0)
    kxc, kyc, kxt, kp = jax.random.split(key, 4)
    xc = jax.random.normal(kxc, (B, num_ctx, dim_x), F32)
    yc = jax.random.normal(kyc, (B, num_ctx, dim_yc), F32)
    xt = jax.random.normal(kxt, (B, num_tgt, dim_x), F32)

    tparams = init_torch_params(kp, dim_x, dim_yc, dim_yt, dim_h, nhead, nlayers, share_blocks)
    kparams = prepare_params(tparams, nhead)

    out = tfsfullpn_forward(xc, yc, xt, kparams, nhead, nlayers, share_blocks)
    out = jax.block_until_ready(out)
    assert out.shape == (B, num_tgt, dim_yt), out.shape

    ref = ref_forward(xc, yc, xt, tparams, nhead, nlayers, share_blocks)
    err = float(jnp.max(jnp.abs(out - ref)))
    assert jnp.allclose(out, ref, atol=2e-2, rtol=2e-2), f"mismatch vs reference: max abs diff = {err}"

    print("KERNEL_OK")
</pallas_src>

<mosaic_0001>
module attributes {stable_mosaic.version = 11 : i64} {
  func.func @_mlp_kernel(%arg0: i32, %arg1: memref<32x3xf32, #tpu.memory_space<vmem>>, %arg2: memref<3x128xbf16, #tpu.memory_space<vmem>>, %arg3: memref<1x128xf32, #tpu.memory_space<vmem>>, %arg4: memref<128x128xbf16, #tpu.memory_space<vmem>>, %arg5: memref<1x128xf32, #tpu.memory_space<vmem>>, %arg6: memref<128x128xbf16, #tpu.memory_space<vmem>>, %arg7: memref<1x128xf32, #tpu.memory_space<vmem>>, %arg8: memref<32x128xf32, #tpu.memory_space<vmem>>) attributes {dimension_semantics = [#tpu.dimension_semantics<parallel>], iteration_bounds = array<i64: 1>, scalar_prefetch = 0 : i64, scratch_operands = 0 : i64, tpu.core_type = #tpu.core_type<tc>, window_params = [{transform_indices = @transform_0, window_bounds = array<i64: 32, 3>}, {pipeline_mode = #tpu.pipeline_mode<synchronous>, transform_indices = @transform_1, window_bounds = array<i64: 3, 128>}, {pipeline_mode = #tpu.pipeline_mode<synchronous>, transform_indices = @transform_2, window_bounds = array<i64: 1, 128>}, {pipeline_mode = #tpu.pipeline_mode<synchronous>, transform_indices = @transform_3, window_bounds = array<i64: 128, 128>}, {pipeline_mode = #tpu.pipeline_mode<synchronous>, transform_indices = @transform_4, window_bounds = array<i64: 1, 128>}, {pipeline_mode = #tpu.pipeline_mode<synchronous>, transform_indices = @transform_5, window_bounds = array<i64: 128, 128>}, {pipeline_mode = #tpu.pipeline_mode<synchronous>, transform_indices = @transform_6, window_bounds = array<i64: 1, 128>}, {transform_indices = @transform_7, window_bounds = array<i64: 32, 128>}]} {
    %c0 = arith.constant 0 : index
    %c0_0 = arith.constant 0 : index
    %0 = vector.load %arg1[%c0, %c0_0] : memref<32x3xf32, #tpu.memory_space<vmem>>, vector<32x3xf32>
    %c0_1 = arith.constant 0 : index
    %c0_2 = arith.constant 0 : index
    %1 = vector.load %arg2[%c0_1, %c0_2] : memref<3x128xbf16, #tpu.memory_space<vmem>>, vector<3x128xbf16>
    %2 = arith.truncf %0 : vector<32x3xf32> to vector<32x3xbf16>
    %cst = arith.constant dense<0.000000e+00> : vector<32x128xf32>
    %3 = tpu.matmul %2, %1, %cst {dimension_numbers = #tpu.dot_dimension_numbers<[1], [0], [0], [1], [0, 0, 1, 1], [], []>} : vector<32x3xbf16>, vector<3x128xbf16>, vector<32x128xf32> -> vector<32x128xf32>
    %c0_3 = arith.constant 0 : index
    %c0_4 = arith.constant 0 : index
    %4 = vector.load %arg3[%c0_3, %c0_4] : memref<1x128xf32, #tpu.memory_space<vmem>>, vector<1x128xf32>
    %5 = vector.broadcast %4 : vector<1x128xf32> to vector<32x128xf32>
    %6 = arith.addf %3, %5 : vector<32x128xf32>
    %cst_5 = arith.constant 0.000000e+00 : f32
    %7 = vector.broadcast %cst_5 : f32 to vector<32x128xf32>
    %8 = arith.maximumf %6, %7 : vector<32x128xf32>
    %c0_6 = arith.constant 0 : index
    %c0_7 = arith.constant 0 : index
    %9 = vector.load %arg4[%c0_6, %c0_7] : memref<128x128xbf16, #tpu.memory_space<vmem>>, vector<128x128xbf16>
    %10 = arith.truncf %8 : vector<32x128xf32> to vector<32x128xbf16>
    %cst_8 = arith.constant dense<0.000000e+00> : vector<32x128xf32>
    %11 = tpu.matmul %10, %9, %cst_8 {dimension_numbers = #tpu.dot_dimension_numbers<[1], [0], [0], [1], [0, 0, 1, 1], [], []>} : vector<32x128xbf16>, vector<128x128xbf16>, vector<32x128xf32> -> vector<32x128xf32>
    %c0_9 = arith.constant 0 : index
    %c0_10 = arith.constant 0 : index
    %12 = vector.load %arg5[%c0_9, %c0_10] : memref<1x128xf32, #tpu.memory_space<vmem>>, vector<1x128xf32>
    %13 = vector.broadcast %12 : vector<1x128xf32> to vector<32x128xf32>
    %14 = arith.addf %11, %13 : vector<32x128xf32>
    %cst_11 = arith.constant 0.000000e+00 : f32
    %15 = vector.broadcast %cst_11 : f32 to vector<32x128xf32>
    %16 = arith.maximumf %14, %15 : vector<32x128xf32>
    %c0_12 = arith.constant 0 : index
    %c0_13 = arith.constant 0 : index
    %17 = vector.load %arg6[%c0_12, %c0_13] : memref<128x128xbf16, #tpu.memory_space<vmem>>, vector<128x128xbf16>
    %18 = arith.truncf %16 : vector<32x128xf32> to vector<32x128xbf16>
    %cst_14 = arith.constant dense<0.000000e+00> : vector<32x128xf32>
    %19 = tpu.matmul %18, %17, %cst_14 {dimension_numbers = #tpu.dot_dimension_numbers<[1], [0], [0], [1], [0, 0, 1, 1], [], []>} : vector<32x128xbf16>, vector<128x128xbf16>, vector<32x128xf32> -> vector<32x128xf32>
    %c0_15 = arith.constant 0 : index
    %c0_16 = arith.constant 0 : index
    %20 = vector.load %arg7[%c0_15, %c0_16] : memref<1x128xf32, #tpu.memory_space<vmem>>, vector<1x128xf32>
    %21 = vector.broadcast %20 : vector<1x128xf32> to vector<32x128xf32>
    %22 = arith.addf %19, %21 : vector<32x128xf32>
    %c0_17 = arith.constant 0 : index
    %c0_18 = arith.constant 0 : index
    %23 = vector.load %arg8[%c0_17, %c0_18] : memref<32x128xf32, #tpu.memory_space<vmem>>, vector<32x128xf32>
    tpu.vector_store %arg8[%c0_17, %c0_18], %22 {strides = array<i32>} : memref<32x128xf32, #tpu.memory_space<vmem>>, vector<32x128xf32>,
    return
  }
  func.func @transform_0(%arg0: i32) -> (i32, i32) {
    %c0_i32 = arith.constant 0 : i32
    %c0_i32_0 = arith.constant 0 : i32
    return %arg0, %c0_i32 : i32, i32
  }
  func.func @transform_1(%arg0: i32) -> (i32, i32) {
    %c0_i32 = arith.constant 0 : i32
    %c0_i32_0 = arith.constant 0 : i32
    %c0_i32_1 = arith.constant 0 : i32
    return %c0_i32, %c0_i32_0 : i32, i32
  }
  func.func @transform_2(%arg0: i32) -> (i32, i32) {
    %c0_i32 = arith.constant 0 : i32
    %c0_i32_0 = arith.constant 0 : i32
    %c0_i32_1 = arith.constant 0 : i32
    return %c0_i32, %c0_i32_0 : i32, i32
  }
  func.func @transform_3(%arg0: i32) -> (i32, i32) {
    %c0_i32 = arith.constant 0 : i32
    %c0_i32_0 = arith.constant 0 : i32
    %c0_i32_1 = arith.constant 0 : i32
    return %c0_i32, %c0_i32_0 : i32, i32
  }
  func.func @transform_4(%arg0: i32) -> (i32, i32) {
    %c0_i32 = arith.constant 0 : i32
    %c0_i32_0 = arith.constant 0 : i32
    %c0_i32_1 = arith.constant 0 : i32
    return %c0_i32, %c0_i32_0 : i32, i32
  }
  func.func @transform_5(%arg0: i32) -> (i32, i32) {
    %c0_i32 = arith.constant 0 : i32
    %c0_i32_0 = arith.constant 0 : i32
    %c0_i32_1 = arith.constant 0 : i32
    return %c0_i32, %c0_i32_0 : i32, i32
  }
  func.func @transform_6(%arg0: i32) -> (i32, i32) {
    %c0_i32 = arith.constant 0 : i32
    %c0_i32_0 = arith.constant 0 : i32
    %c0_i32_1 = arith.constant 0 : i32
    return %c0_i32, %c0_i32_0 : i32, i32
  }
  func.func @transform_7(%arg0: i32) -> (i32, i32) {
    %c0_i32 = arith.constant 0 : i32
    %c0_i32_0 = arith.constant 0 : i32
    return %arg0, %c0_i32 : i32, i32
  }
}

</mosaic_0001>

<bundles_post_ra>
// kernel: tpu_custom_call.1
= control target key start
LH: loop header
LB: loop body
LE: loop exit
PB: predicated region body
PF: predicated region fallthrough
CT: control target
= control target key end

     0   :  { %12 = vsyncpa [#allocation3], 0  ;;  %s668_s0 = inlined_call_operand.vmem [shape: f32[32,3], index: 0, kind: input, shape index: {}]   ;;  %s669_s1 = inlined_call_operand.vmem [shape: bf16[3,128], index: 1, kind: input, shape index: {}]   ;;  %s670_s2 = inlined_call_operand.vmem [shape: f32[1,128], index: 2, kind: input, shape index: {}]   ;;  %s671_s3 = inlined_call_operand.hbm [shape: bf16[128,128], index: 3, kind: input, shape index: {}]   ;;  %s672_s4 = inlined_call_operand.vmem [shape: f32[1,128], index: 4, kind: input, shape index: {}]   ;;  %s673_s5 = inlined_call_operand.hbm [shape: bf16[128,128], index: 5, kind: input, shape index: {}]   ;;  %s674_s6 = inlined_call_operand.vmem [shape: f32[1,128], index: 6, kind: input, shape index: {}]   ;;  %s675_s7 = inlined_call_operand.hbm [shape: f32[32,128], index: 7, kind: output, shape index: {}]  }
   0x1   :  { %13 = vsyncpa [#allocation6], 0 }
   0x2   :  { %14 = vsyncpa [#allocation4], 0  ;;  %s587_s24 = smov [#allocation2]  }
   0x3   :  { %s26_s25 = sshll.u32 %s587_s24, 4  ;;  %s27_s25 = int_to_ptr.vmem [resolvable:$true] %s26_s25 }
   0x4   :  { %s529_s26 = scalar_lea.vmem %s27_s25, 1024  ;;  %p534_p1 = scmp.lt.s32.totalorder %s27_s25, %s27_s25 }
   0x5   :  { %p530_p0 = scmp.ne.s32.totalorder %s27_s25, %s529_s26  ;;  %p535_p2 = scmp.lt.s32.totalorder %s529_s26, %s529_s26 }
   0x7   :  { %p536_p3 = por %p535_p2, %p534_p1 }
   0x9   :  { %p537_p4 = pnand %p536_p3, %p530_p0 }
   0xb   :  { %540 = shalt.err (!%p537_p4)
}
   0xc   :  { %s588_s27 = smov 64   ;;  %s589_s28 = smov 4  }
   0xd   :  { %32 = dma.hbm_to_vmem [thread:$0]  %s671_s3, 1024, %s27_s25, [#allocation3], %s588_s27, %s588_s27, %s589_s28  }
   0xe   :  { %s590_s8 = smov [#allocation5]  }
   0xf   :  { %s40_s9 = sshll.u32 %s590_s8, 4  ;;  %s41_s9 = int_to_ptr.vmem [resolvable:$true] %s40_s9 }
  0x10   :  { %s549_s10 = scalar_lea.vmem %s41_s9, 1024  ;;  %p554_p6 = scmp.lt.s32.totalorder %s41_s9, %s41_s9 }
  0x11   :  { %p550_p5 = scmp.ne.s32.totalorder %s41_s9, %s549_s10  ;;  %p555_p7 = scmp.lt.s32.totalorder %s549_s10, %s549_s10 }
  0x13   :  { %p556_p8 = por %p555_p7, %p554_p6 }
  0x15   :  { %p557_p9 = pnand %p556_p8, %p550_p5 }
  0x17   :  { %560 = shalt.err (!%p557_p9)
}
  0x18   :  { %46 = dma.hbm_to_vmem [thread:$0]  %s673_s5, 1024, %s41_s9, [#allocation6], %s588_s27, %s588_s27, %s589_s28  }
  0x19   :  { %581 = dma.done.wait [#allocation3], 1024  }
  0x1a   :  { %582 = vsyncadd [#allocation3], 4294966272 }
  0x1b   :  { %583 = dma.done.wait [#allocation6], 1024  }
  0x1c   :  { %584 = vsyncadd [#allocation6], 4294966272  ;;  %vm77_vm0 = vcmask 1040384   ;;  %vm78_vm1 = vcmask 1041408   ;;  %v591_v0 = vmov 65535   ;;  %v56_v4 = vld [vmem:[%s668_s0] sm:$0xff] }
  0x1d   :  { %v79_v1 = vsel %vm77_vm0, 4294967295, %v591_v0  ;;  %v60_v3 = vld [vmem:[%s669_s1] sm:$0x3]  ;;  %v57_v5 = vld [vmem:[%s668_s0 + $0x8] sm:$0xff]  ;;  %vm70_vm2 = vcmask 23552   ;;  %v58_v8 = vld [vmem:[%s668_s0 + $0x10] sm:$0xff] }
  0x1e   :  { %v80_v2 = vsel %vm78_vm1, %v79_v1, 0  ;;  %v61_v7 = vpack.c.bf16 %v57_v5, %v56_v4  ;;  %v59_v9 = vld [vmem:[%s668_s0 + $0x18] sm:$0xff]  ;;  %v506_v12 = vld [vmem:[#allocation2 + $0x30] sm:$0xff]   ;;  %v507_v13 = vld [vmem:[#allocation2 + $0x28] sm:$0xff]  }
  0x1f   :  { %v82_v6 = vand.u32 %v80_v2, %v60_v3  ;;  %v505_v10 = vld [vmem:[#allocation2 + $0x38] sm:$0xff]   ;;  %v62_v11 = vpack.c.bf16 %v59_v9, %v58_v8  ;;  %v508_v14 = vld [vmem:[#allocation2 + $0x20] sm:$0xff]   ;;  %v510_v16 = vld [vmem:[#allocation2 + $0x10] sm:$0xff]  }
  0x20   :  { %453 = vmatprep.mubr.msk.bf16.mxu0 %vm70_vm2, %v61_v7  ;;  %457 = vmatprep.subr.bf16.mxu1 %v505_v10  ;;  %v509_v15 = vld [vmem:[#allocation2 + $0x18] sm:$0xff]   ;;  %v511_v17 = vld [vmem:[#allocation2 + $0x8] sm:$0xff]   ;;  %v512_v18 = vld [vmem:[#allocation2] sm:$0xff]  }
  0x21   :  { %451 = vmatprep.subr.bf16.mxu0 %v82_v6  ;;  %458 = vmatpush3.bf16.msra.mxu1 %v505_v10  ;;  %v513_v19 = vld [vmem:[#allocation5 + $0x38] sm:$0xff]   ;;  %v514_v20 = vld [vmem:[#allocation5 + $0x30] sm:$0xff]   ;;  %v515_v21 = vld [vmem:[#allocation5 + $0x28] sm:$0xff]  }
  0x22   :  { %452 = vmatpush3.bf16.msra.mxu0 %v82_v6  ;;  %459 = vmatprep.subr.bf16.mxu1 %v506_v12  ;;  %v516_v22 = vld [vmem:[#allocation5 + $0x20] sm:$0xff]   ;;  %v517_v23 = vld [vmem:[#allocation5 + $0x18] sm:$0xff]   ;;  %v518_v39 = vld [vmem:[#allocation5 + $0x10] sm:$0xff]  }
  0x23   :  { %477 = vmatprep.subr.bf16.mxu0 %v513_v19  ;;  %v407_v26 = vld [vmem:[%s670_s2] ss:$0 sm:$0xff]  ;;  %v519_v40 = vld [vmem:[#allocation5 + $0x8] sm:$0xff]  }
  0x24   :  { %v520_v41 = vld [vmem:[#allocation5] sm:$0xff]  }
  0x25   :  { %454 = vmatmul.mubr.msk.bf16.vlgmr.msra.gmra.mxu0 %vm70_vm2, %v62_v11  ;;  %460 = vmatpush3.bf16.msra.mxu1 %v506_v12  ;;  %v410_v44 = vld [vmem:[%s672_s4] ss:$0 sm:$0xff]  ;;  %s592_s4 = smov [#allocation7]  }
  0x26   :  { %461 = vmatprep.subr.bf16.mxu1 %v507_v13  ;;  %478 = vmatpush3.bf16.msra.mxu0 %v513_v19  ;;  %v419_v57 = vld [vmem:[%s674_s6] ss:$0 sm:$0xff]  ;;  %s394_s24 = sshll.u32 %s592_s4, 4  ;;  %s395_s24 = int_to_ptr.vmem [resolvable:$true] %s394_s24 }
  0x27   :  { %479 = vmatprep.subr.bf16.mxu0 %v514_v20  ;;  %s561_s25 = scalar_lea.vmem %s395_s24, 512  ;;  %p566_p11 = scmp.lt.s32.totalorder %s395_s24, %s395_s24 }
  0x28   :  { %p562_p10 = scmp.ne.s32.totalorder %s395_s24, %s561_s25  ;;  %p567_p12 = scmp.lt.s32.totalorder %s561_s25, %s561_s25 }
  0x29   :  { %462 = vmatpush3.bf16.msra.mxu1 %v507_v13 }
  0x2a   :  { %463 = vmatprep.subr.bf16.mxu1 %v508_v14  ;;  %480 = vmatpush3.bf16.msra.mxu0 %v514_v20  ;;  %p568_p13 = por %p567_p12, %p566_p11 }
  0x2b   :  { %481 = vmatprep.subr.bf16.mxu0 %v515_v21 }
  0x2c   :  { %p569_p0 = pnand %p568_p13, %p562_p10 }
  0x2d   :  { %464 = vmatpush3.bf16.msra.mxu1 %v508_v14 }
  0x2e   :  { %465 = vmatprep.subr.bf16.mxu1 %v509_v15  ;;  %482 = vmatpush3.bf16.msra.mxu0 %v515_v21 }
  0x2f   :  { %483 = vmatprep.subr.bf16.mxu0 %v516_v22 }
  0x31   :  { %466 = vmatpush3.bf16.msra.mxu1 %v509_v15 }
  0x32   :  { %467 = vmatprep.subr.bf16.mxu1 %v510_v16  ;;  %484 = vmatpush3.bf16.msra.mxu0 %v516_v22 }
  0x33   :  { %485 = vmatprep.subr.bf16.mxu0 %v517_v23 }
  0x35   :  { %468 = vmatpush3.bf16.msra.mxu1 %v510_v16 }
  0x36   :  { %469 = vmatprep.subr.bf16.mxu1 %v511_v17  ;;  %486 = vmatpush3.bf16.msra.mxu0 %v517_v23 }
  0x37   :  { %487 = vmatprep.subr.bf16.mxu0 %v518_v39 }
  0x39   :  { %470 = vmatpush3.bf16.msra.mxu1 %v511_v17 }
  0x3a   :  { %471 = vmatprep.subr.bf16.mxu1 %v512_v18  ;;  %488 = vmatpush3.bf16.msra.mxu0 %v518_v39 }
  0x3b   :  { %489 = vmatprep.subr.bf16.mxu0 %v519_v40 }
  0x3d   :  { %472 = vmatpush3.bf16.msra.mxu1 %v512_v18 }
  0x3e   :  { %490 = vmatpush3.bf16.msra.mxu0 %v519_v40 }
  0x3f   :  { %491 = vmatprep.subr.bf16.mxu0 %v520_v41 }
  0x42   :  { %492 = vmatpush3.bf16.msra.mxu0 %v520_v41 }
  0xe5   :  { %v455_v24 = vpop.f32.mrf.mxu0 }
  0xe6   :  { %v127_v30 = vadd.f32 %v455_v24, %v407_v26 }
  0xe7   :  { %v118_v25 = vpop.f32.mrf.mxu0 }
  0xe8   :  { %v119_v28 = vadd.f32 %v407_v26, %v118_v25  ;;  %v135_v36 = vmax.f32 %v127_v30, 0.0 }
  0xe9   :  { %v456_v27 = vpop.f32.mrf.mxu0 }
  0xea   :  { %v130_v29 = vadd.f32 %v456_v27, %v407_v26  ;;  %v133_v34 = vmax.f32 %v119_v28, 0.0 }
  0xeb   :  { %v121_v31 = vpop.f32.mrf.mxu0 }
  0xec   :  { %v122_v32 = vadd.f32 %v407_v26, %v121_v31  ;;  %v136_v33 = vmax.f32 %v130_v29, 0.0 }
  0xee   :  { %v134_v35 = vmax.f32 %v122_v32, 0.0  ;;  %v154_v38 = vpack.c.bf16 %v136_v33, %v135_v36 }
  0xf0   :  { %v153_v37 = vpack.c.bf16 %v134_v35, %v133_v34 }
  0xf2   :  { %473 = vmatprep.mubr.bf16.mxu1 %v153_v37 }
  0xf3   :  { %474 = vmatmul.mubr.bf16.vlgmr.msra.gmra.mxu1 %v154_v38 }
 0x1b3   :  { %v475_v42 = vpop.f32.mrf.mxu1 }
 0x1b4   :  { %v253_v48 = vadd.f32 %v475_v42, %v410_v44 }
 0x1b5   :  { %v244_v43 = vpop.f32.mrf.mxu1 }
 0x1b6   :  { %v245_v46 = vadd.f32 %v410_v44, %v244_v43  ;;  %v261_v54 = vmax.f32 %v253_v48, 0.0 }
 0x1b7   :  { %v476_v45 = vpop.f32.mrf.mxu1 }
 0x1b8   :  { %v256_v47 = vadd.f32 %v476_v45, %v410_v44  ;;  %v259_v52 = vmax.f32 %v245_v46, 0.0 }
 0x1b9   :  { %v247_v49 = vpop.f32.mrf.mxu1 }
 0x1ba   :  { %v248_v50 = vadd.f32 %v410_v44, %v247_v49  ;;  %v262_v51 = vmax.f32 %v256_v47, 0.0 }
 0x1bc   :  { %v260_v53 = vmax.f32 %v248_v50, 0.0  ;;  %v280_v56 = vpack.c.bf16 %v262_v51, %v261_v54 }
 0x1be   :  { %v279_v55 = vpack.c.bf16 %v260_v53, %v259_v52 }
 0x1c0   :  { %493 = vmatprep.mubr.bf16.mxu0 %v279_v55 }
 0x1c1   :  { %494 = vmatmul.mubr.bf16.vlgmr.msra.gmra.mxu0 %v280_v56 }
 0x281   :  { %v495_v58 = vpop.f32.mrf.mxu0 }
 0x282   :  { %v379_v59 = vadd.f32 %v495_v58, %v419_v57 }
 0x283   :  { %v370_v60 = vpop.f32.mrf.mxu0 }
 0x284   :  { %387 = vst [vmem:[#allocation7 + $0x10] sm:$0xff] %v379_v59  ;;  %v371_v61 = vadd.f32 %v419_v57, %v370_v60 }
 0x285   :  { %v496_v62 = vpop.f32.mrf.mxu0 }
 0x286   :  { %385 = vst [vmem:[#allocation7] sm:$0xff] %v371_v61  ;;  %v382_v63 = vadd.f32 %v496_v62, %v419_v57 }
 0x287   :  { %v373_v0 = vpop.f32.mrf.mxu0 }
 0x288   :  { %388 = vst [vmem:[#allocation7 + $0x18] sm:$0xff] %v382_v63  ;;  %v374_v1 = vadd.f32 %v419_v57, %v373_v0 }
 0x28a   :  { %386 = vst [vmem:[#allocation7 + $0x8] sm:$0xff] %v374_v1 }
 0x28b   :  { %572 = shalt.err (!%p569_p0)
}
 0x28c   :  { %s593_s6 = smov 128   ;;  %s594_s26 = smov 8  }
 0x28d   :  { %400 = dma.vmem_to_hbm [thread:$0]  %s395_s24, 512, %s675_s7, [#allocation4], %s593_s6, %s593_s6, %s594_s26  }
 0x28e   :  { %585 = dma.done.wait [#allocation4], 512  }
 0x28f   :  { %586 = vsyncadd [#allocation4], 4294966784 }
 0x290   :  { %404 = vsyncpa [#allocation3], 1 }
 0x291   :  { %405 = vsyncpa [#allocation6], 1 }
 0x292   :  { %406 = vsyncpa [#allocation4], 1 }

</bundles_post_ra>
